<compile_context>
chip_gen: v5e
topology: v5e:2x2
jax: 0.10.0
libtpu: 0.0.40
codegen_flags: <defaults>
</compile_context>

<pallas_src>
import jax
import jax.numpy as jnp
from jax.experimental import pallas as pl
from jax.experimental.pallas import tpu as pltpu

MIN_LENGTH = 50.0
MAX_LENGTH = 2000.0
OUT_OFF = MIN_LENGTH + 0.5 * (MAX_LENGTH - MIN_LENGTH)   # 1025.0
OUT_SCALE = 0.5 * (MAX_LENGTH - MIN_LENGTH)              # 975.0

LANES = 128           # vreg lane width
MAX_TILE_ROWS = 4096  # rows per grid step (4096x128 f32 = 2 MiB per buffer)


def _seg_len_kernel(x_ref, t_ref, k_ref, s_ref, out_ref):
    # x_ref/out_ref: (tile_rows, 128) f32 VMEM tiles, batch is lane-dense.
    # t_ref/k_ref: (16,) f32 in SMEM; s_ref: (2,) f32 in SMEM = [0.5*A, 0.5*C].
    x = x_ref[...]
    hidden = t_ref.shape[0]

    # acc = 0.5 * (pre-sigmoid MLP output); scalar-broadcast VPU ops only.
    acc = x * s_ref[0] + s_ref[1]
    for j in range(hidden):
        acc = acc + jnp.abs(x + t_ref[j]) * k_ref[j]

    # sigmoid(y) = 0.5 + 0.5*tanh(0.5*y); 0.5*y == acc, 0.5 factors folded
    # into OUT_OFF / OUT_SCALE.  tanh runs on the EUP slot.
    out_ref[...] = OUT_OFF + OUT_SCALE * jnp.tanh(acc)


def _prep_params(w1, b1, w2, b2):
    """Fold Linear(1,16)->ReLU->Linear(16,1) into abs-form coefficients.

    y = b2 + sum_j w2_j * relu(w1_j*x + b1_j)
      = C + A*x + sum_j K_j * |x + t_j|          (relu(z) = 0.5*z + 0.5*|z|)
    Returns the 0.5-scaled versions (for the tanh sigmoid): t, k=0.5*K,
    scal=[0.5*A, 0.5*C].
    """
    w1f = jnp.ravel(w1).astype(jnp.float32)
    b1f = jnp.ravel(b1).astype(jnp.float32)
    w2f = jnp.ravel(w2).astype(jnp.float32)
    b2f = jnp.ravel(b2).astype(jnp.float32)

    nonzero = w1f != 0.0
    safe_w1 = jnp.where(nonzero, w1f, 1.0)
    t = jnp.where(nonzero, b1f / safe_w1, 0.0)
    k = 0.25 * w2f * jnp.abs(w1f)                    # 0.5 (relu) * 0.5 (tanh)
    a_h = 0.25 * jnp.sum(w2f * w1f)
    c_h = (0.5 * b2f[0]
           + 0.25 * jnp.sum(w2f * b1f)
           + 0.25 * jnp.sum(jnp.where(nonzero, 0.0, w2f * jnp.abs(b1f))))
    scal = jnp.stack([a_h, c_h]).astype(jnp.float32)
    return t, k, scal


def _dim_semantics(grid_len):
    # Plain "parallel" does not shard the grid across v7x's two TensorCores;
    # CORE_PARALLEL does.  Guarded so v5e/v6e (single TC) keep default codegen.
    try:
        kind = jax.devices()[0].device_kind.lower()
    except Exception:  # pragma: no cover - defensive
        kind = ""
    if ("v7" in kind or "7x" in kind) and grid_len >= 2 and grid_len % 2 == 0:
        return (pltpu.CORE_PARALLEL,)
    return ("parallel",)


def learned_segment_length(x, w1, b1, w2, b2):
    """x: (B, 1) or (B,) float.  Returns segment lengths with x's shape."""
    orig_shape = x.shape
    xf = jnp.ravel(x).astype(jnp.float32)
    B = xf.shape[0]

    t, k, scal = _prep_params(w1, b1, w2, b2)

    # Lane-dense view (rows, 128), rows a multiple of 8 sublanes.  Pad only to
    # a multiple of 8*128 = 1024 elements (tiny), never to a full tile.
    rows = pl.cdiv(B, LANES * 8) * 8
    padded = rows * LANES
    if padded != B:
        xf = jnp.pad(xf, (0, padded - B))
    x2 = xf.reshape(rows, LANES)

    tile_rows = min(MAX_TILE_ROWS, rows)
    grid_len = pl.cdiv(rows, tile_rows)   # partial last block handled by Pallas

    smem_spec = pl.BlockSpec(memory_space=pltpu.MemorySpace.SMEM)

    out2 = pl.pallas_call(
        _seg_len_kernel,
        out_shape=jax.ShapeDtypeStruct((rows, LANES), jnp.float32),
        grid=(grid_len,),
        in_specs=[
            pl.BlockSpec((tile_rows, LANES), lambda i: (i, 0)),  # x tile (VMEM)
            smem_spec,   # t    (16,)
            smem_spec,   # k    (16,)
            smem_spec,   # scal (2,) = [0.5*A, 0.5*C]
        ],
        out_specs=pl.BlockSpec((tile_rows, LANES), lambda i: (i, 0)),
        compiler_params=pltpu.CompilerParams(
            dimension_semantics=_dim_semantics(grid_len)),
    )(x2, t, k, scal)

    if padded == B:
        # Fast path: no slice copy when the batch is already 1024-aligned.
        return out2.reshape(orig_shape)
    return out2.reshape(-1)[:B].reshape(orig_shape)


def _ref_forward(x, w1, b1, w2, b2):
    # Pure-JAX reference of the PyTorch module.
    xf = jnp.ravel(x).astype(jnp.float32)[:, None]            # (B, 1)
    w1f = jnp.ravel(w1); b1f = jnp.ravel(b1)
    w2f = jnp.ravel(w2); b2f = jnp.ravel(b2)
    h = jnp.maximum(xf * w1f[None, :] + b1f[None, :], 0.0)    # (B, 16)
    y = h @ w2f[:, None] + b2f[None, :]                       # (B, 1)
    s = jax.nn.sigmoid(y)
    out = MIN_LENGTH + (MAX_LENGTH - MIN_LENGTH) * s
    return out.reshape(x.shape)


if __name__ == "__main__":
    key = jax.random.PRNGKey(0)
    k_x, k_w1, k_b1, k_w2, k_b2, k_big, k_al = jax.random.split(key, 7)

    # Deterministic synthetic parameters (shapes from Linear(1,16)/Linear(16,1)).
    w1 = jax.random.normal(k_w1, (16,), dtype=jnp.float32) * 0.5
    b1 = jax.random.normal(k_b1, (16,), dtype=jnp.float32) * 0.1
    w2 = jax.random.normal(k_w2, (16,), dtype=jnp.float32) * 0.5
    b2 = jax.random.normal(k_b2, (1,), dtype=jnp.float32) * 0.1

    # Small case matching the module's (B, 1) input convention.
    B = 8
    x = jax.random.normal(k_x, (B, 1), dtype=jnp.float32)
    out = jax.block_until_ready(learned_segment_length(x, w1, b1, w2, b2))
    ref = _ref_forward(x, w1, b1, w2, b2)
    assert out.shape == (B, 1)
    assert jnp.allclose(out, ref, rtol=1e-3, atol=1.0), (out, ref)

    # Larger case exercising the tiny pad + partial last block + multi-tile grid.
    B2 = 2 * MAX_TILE_ROWS * LANES + 100
    x_big = jax.random.normal(k_big, (B2, 1), dtype=jnp.float32)
    out_big = jax.block_until_ready(learned_segment_length(x_big, w1, b1, w2, b2))
    ref_big = _ref_forward(x_big, w1, b1, w2, b2)
    assert out_big.shape == (B2, 1)
    assert jnp.allclose(out_big, ref_big, rtol=1e-3, atol=1.0)

    # Aligned case hitting the no-pad / no-slice fast path.
    B3 = 8 * 1024
    x_al = jax.random.normal(k_al, (B3, 1), dtype=jnp.float32)
    out_al = jax.block_until_ready(learned_segment_length(x_al, w1, b1, w2, b2))
    ref_al = _ref_forward(x_al, w1, b1, w2, b2)
    assert out_al.shape == (B3, 1)
    assert jnp.allclose(out_al, ref_al, rtol=1e-3, atol=1.0)

    print("KERNEL_OK")
</pallas_src>

<mosaic_0001>
module attributes {stable_mosaic.version = 11 : i64} {
  func.func @_seg_len_kernel(%arg0: i32, %arg1: memref<8x128xf32, #tpu.memory_space<vmem>>, %arg2: memref<16xf32, #tpu.memory_space<smem>>, %arg3: memref<16xf32, #tpu.memory_space<smem>>, %arg4: memref<2xf32, #tpu.memory_space<smem>>, %arg5: memref<8x128xf32, #tpu.memory_space<vmem>>) attributes {dimension_semantics = [#tpu.dimension_semantics<parallel>], iteration_bounds = array<i64: 1>, scalar_prefetch = 0 : i64, scratch_operands = 0 : i64, tpu.core_type = #tpu.core_type<tc>, window_params = [{transform_indices = @transform_0, window_bounds = array<i64: 8, 128>}, {transform_indices = @transform_1, window_bounds = array<i64: 16>}, {transform_indices = @transform_2, window_bounds = array<i64: 16>}, {transform_indices = @transform_3, window_bounds = array<i64: 2>}, {transform_indices = @transform_4, window_bounds = array<i64: 8, 128>}]} {
    %c0 = arith.constant 0 : index
    %c0_0 = arith.constant 0 : index
    %0 = vector.load %arg1[%c0, %c0_0] : memref<8x128xf32, #tpu.memory_space<vmem>>, vector<8x128xf32>
    %c0_1 = arith.constant 0 : index
    %1 = memref.load %arg4[%c0_1] : memref<2xf32, #tpu.memory_space<smem>>
    %2 = vector.broadcast %1 : f32 to vector<8x128xf32>
    %3 = arith.mulf %0, %2 : vector<8x128xf32>
    %c1 = arith.constant 1 : index
    %4 = memref.load %arg4[%c1] : memref<2xf32, #tpu.memory_space<smem>>
    %5 = vector.broadcast %4 : f32 to vector<8x128xf32>
    %6 = arith.addf %3, %5 : vector<8x128xf32>
    %c0_2 = arith.constant 0 : index
    %7 = memref.load %arg2[%c0_2] : memref<16xf32, #tpu.memory_space<smem>>
    %8 = vector.broadcast %7 : f32 to vector<8x128xf32>
    %9 = arith.addf %0, %8 : vector<8x128xf32>
    %10 = math.absf %9 : vector<8x128xf32>
    %c0_3 = arith.constant 0 : index
    %11 = memref.load %arg3[%c0_3] : memref<16xf32, #tpu.memory_space<smem>>
    %12 = vector.broadcast %11 : f32 to vector<8x128xf32>
    %13 = arith.mulf %10, %12 : vector<8x128xf32>
    %14 = arith.addf %6, %13 : vector<8x128xf32>
    %c1_4 = arith.constant 1 : index
    %15 = memref.load %arg2[%c1_4] : memref<16xf32, #tpu.memory_space<smem>>
    %16 = vector.broadcast %15 : f32 to vector<8x128xf32>
    %17 = arith.addf %0, %16 : vector<8x128xf32>
    %18 = math.absf %17 : vector<8x128xf32>
    %c1_5 = arith.constant 1 : index
    %19 = memref.load %arg3[%c1_5] : memref<16xf32, #tpu.memory_space<smem>>
    %20 = vector.broadcast %19 : f32 to vector<8x128xf32>
    %21 = arith.mulf %18, %20 : vector<8x128xf32>
    %22 = arith.addf %14, %21 : vector<8x128xf32>
    %c2 = arith.constant 2 : index
    %23 = memref.load %arg2[%c2] : memref<16xf32, #tpu.memory_space<smem>>
    %24 = vector.broadcast %23 : f32 to vector<8x128xf32>
    %25 = arith.addf %0, %24 : vector<8x128xf32>
    %26 = math.absf %25 : vector<8x128xf32>
    %c2_6 = arith.constant 2 : index
    %27 = memref.load %arg3[%c2_6] : memref<16xf32, #tpu.memory_space<smem>>
    %28 = vector.broadcast %27 : f32 to vector<8x128xf32>
    %29 = arith.mulf %26, %28 : vector<8x128xf32>
    %30 = arith.addf %22, %29 : vector<8x128xf32>
    %c3 = arith.constant 3 : index
    %31 = memref.load %arg2[%c3] : memref<16xf32, #tpu.memory_space<smem>>
    %32 = vector.broadcast %31 : f32 to vector<8x128xf32>
    %33 = arith.addf %0, %32 : vector<8x128xf32>
    %34 = math.absf %33 : vector<8x128xf32>
    %c3_7 = arith.constant 3 : index
    %35 = memref.load %arg3[%c3_7] : memref<16xf32, #tpu.memory_space<smem>>
    %36 = vector.broadcast %35 : f32 to vector<8x128xf32>
    %37 = arith.mulf %34, %36 : vector<8x128xf32>
    %38 = arith.addf %30, %37 : vector<8x128xf32>
    %c4 = arith.constant 4 : index
    %39 = memref.load %arg2[%c4] : memref<16xf32, #tpu.memory_space<smem>>
    %40 = vector.broadcast %39 : f32 to vector<8x128xf32>
    %41 = arith.addf %0, %40 : vector<8x128xf32>
    %42 = math.absf %41 : vector<8x128xf32>
    %c4_8 = arith.constant 4 : index
    %43 = memref.load %arg3[%c4_8] : memref<16xf32, #tpu.memory_space<smem>>
    %44 = vector.broadcast %43 : f32 to vector<8x128xf32>
    %45 = arith.mulf %42, %44 : vector<8x128xf32>
    %46 = arith.addf %38, %45 : vector<8x128xf32>
    %c5 = arith.constant 5 : index
    %47 = memref.load %arg2[%c5] : memref<16xf32, #tpu.memory_space<smem>>
    %48 = vector.broadcast %47 : f32 to vector<8x128xf32>
    %49 = arith.addf %0, %48 : vector<8x128xf32>
    %50 = math.absf %49 : vector<8x128xf32>
    %c5_9 = arith.constant 5 : index
    %51 = memref.load %arg3[%c5_9] : memref<16xf32, #tpu.memory_space<smem>>
    %52 = vector.broadcast %51 : f32 to vector<8x128xf32>
    %53 = arith.mulf %50, %52 : vector<8x128xf32>
    %54 = arith.addf %46, %53 : vector<8x128xf32>
    %c6 = arith.constant 6 : index
    %55 = memref.load %arg2[%c6] : memref<16xf32, #tpu.memory_space<smem>>
    %56 = vector.broadcast %55 : f32 to vector<8x128xf32>
    %57 = arith.addf %0, %56 : vector<8x128xf32>
    %58 = math.absf %57 : vector<8x128xf32>
    %c6_10 = arith.constant 6 : index
    %59 = memref.load %arg3[%c6_10] : memref<16xf32, #tpu.memory_space<smem>>
    %60 = vector.broadcast %59 : f32 to vector<8x128xf32>
    %61 = arith.mulf %58, %60 : vector<8x128xf32>
    %62 = arith.addf %54, %61 : vector<8x128xf32>
    %c7 = arith.constant 7 : index
    %63 = memref.load %arg2[%c7] : memref<16xf32, #tpu.memory_space<smem>>
    %64 = vector.broadcast %63 : f32 to vector<8x128xf32>
    %65 = arith.addf %0, %64 : vector<8x128xf32>
    %66 = math.absf %65 : vector<8x128xf32>
    %c7_11 = arith.constant 7 : index
    %67 = memref.load %arg3[%c7_11] : memref<16xf32, #tpu.memory_space<smem>>
    %68 = vector.broadcast %67 : f32 to vector<8x128xf32>
    %69 = arith.mulf %66, %68 : vector<8x128xf32>
    %70 = arith.addf %62, %69 : vector<8x128xf32>
    %c8 = arith.constant 8 : index
    %71 = memref.load %arg2[%c8] : memref<16xf32, #tpu.memory_space<smem>>
    %72 = vector.broadcast %71 : f32 to vector<8x128xf32>
    %73 = arith.addf %0, %72 : vector<8x128xf32>
    %74 = math.absf %73 : vector<8x128xf32>
    %c8_12 = arith.constant 8 : index
    %75 = memref.load %arg3[%c8_12] : memref<16xf32, #tpu.memory_space<smem>>
    %76 = vector.broadcast %75 : f32 to vector<8x128xf32>
    %77 = arith.mulf %74, %76 : vector<8x128xf32>
    %78 = arith.addf %70, %77 : vector<8x128xf32>
    %c9 = arith.constant 9 : index
    %79 = memref.load %arg2[%c9] : memref<16xf32, #tpu.memory_space<smem>>
    %80 = vector.broadcast %79 : f32 to vector<8x128xf32>
    %81 = arith.addf %0, %80 : vector<8x128xf32>
    %82 = math.absf %81 : vector<8x128xf32>
    %c9_13 = arith.constant 9 : index
    %83 = memref.load %arg3[%c9_13] : memref<16xf32, #tpu.memory_space<smem>>
    %84 = vector.broadcast %83 : f32 to vector<8x128xf32>
    %85 = arith.mulf %82, %84 : vector<8x128xf32>
    %86 = arith.addf %78, %85 : vector<8x128xf32>
    %c10 = arith.constant 10 : index
    %87 = memref.load %arg2[%c10] : memref<16xf32, #tpu.memory_space<smem>>
    %88 = vector.broadcast %87 : f32 to vector<8x128xf32>
    %89 = arith.addf %0, %88 : vector<8x128xf32>
    %90 = math.absf %89 : vector<8x128xf32>
    %c10_14 = arith.constant 10 : index
    %91 = memref.load %arg3[%c10_14] : memref<16xf32, #tpu.memory_space<smem>>
    %92 = vector.broadcast %91 : f32 to vector<8x128xf32>
    %93 = arith.mulf %90, %92 : vector<8x128xf32>
    %94 = arith.addf %86, %93 : vector<8x128xf32>
    %c11 = arith.constant 11 : index
    %95 = memref.load %arg2[%c11] : memref<16xf32, #tpu.memory_space<smem>>
    %96 = vector.broadcast %95 : f32 to vector<8x128xf32>
    %97 = arith.addf %0, %96 : vector<8x128xf32>
    %98 = math.absf %97 : vector<8x128xf32>
    %c11_15 = arith.constant 11 : index
    %99 = memref.load %arg3[%c11_15] : memref<16xf32, #tpu.memory_space<smem>>
    %100 = vector.broadcast %99 : f32 to vector<8x128xf32>
    %101 = arith.mulf %98, %100 : vector<8x128xf32>
    %102 = arith.addf %94, %101 : vector<8x128xf32>
    %c12 = arith.constant 12 : index
    %103 = memref.load %arg2[%c12] : memref<16xf32, #tpu.memory_space<smem>>
    %104 = vector.broadcast %103 : f32 to vector<8x128xf32>
    %105 = arith.addf %0, %104 : vector<8x128xf32>
    %106 = math.absf %105 : vector<8x128xf32>
    %c12_16 = arith.constant 12 : index
    %107 = memref.load %arg3[%c12_16] : memref<16xf32, #tpu.memory_space<smem>>
    %108 = vector.broadcast %107 : f32 to vector<8x128xf32>
    %109 = arith.mulf %106, %108 : vector<8x128xf32>
    %110 = arith.addf %102, %109 : vector<8x128xf32>
    %c13 = arith.constant 13 : index
    %111 = memref.load %arg2[%c13] : memref<16xf32, #tpu.memory_space<smem>>
    %112 = vector.broadcast %111 : f32 to vector<8x128xf32>
    %113 = arith.addf %0, %112 : vector<8x128xf32>
    %114 = math.absf %113 : vector<8x128xf32>
    %c13_17 = arith.constant 13 : index
    %115 = memref.load %arg3[%c13_17] : memref<16xf32, #tpu.memory_space<smem>>
    %116 = vector.broadcast %115 : f32 to vector<8x128xf32>
    %117 = arith.mulf %114, %116 : vector<8x128xf32>
    %118 = arith.addf %110, %117 : vector<8x128xf32>
    %c14 = arith.constant 14 : index
    %119 = memref.load %arg2[%c14] : memref<16xf32, #tpu.memory_space<smem>>
    %120 = vector.broadcast %119 : f32 to vector<8x128xf32>
    %121 = arith.addf %0, %120 : vector<8x128xf32>
    %122 = math.absf %121 : vector<8x128xf32>
    %c14_18 = arith.constant 14 : index
    %123 = memref.load %arg3[%c14_18] : memref<16xf32, #tpu.memory_space<smem>>
    %124 = vector.broadcast %123 : f32 to vector<8x128xf32>
    %125 = arith.mulf %122, %124 : vector<8x128xf32>
    %126 = arith.addf %118, %125 : vector<8x128xf32>
    %c15 = arith.constant 15 : index
    %127 = memref.load %arg2[%c15] : memref<16xf32, #tpu.memory_space<smem>>
    %128 = vector.broadcast %127 : f32 to vector<8x128xf32>
    %129 = arith.addf %0, %128 : vector<8x128xf32>
    %130 = math.absf %129 : vector<8x128xf32>
    %c15_19 = arith.constant 15 : index
    %131 = memref.load %arg3[%c15_19] : memref<16xf32, #tpu.memory_space<smem>>
    %132 = vector.broadcast %131 : f32 to vector<8x128xf32>
    %133 = arith.mulf %130, %132 : vector<8x128xf32>
    %134 = arith.addf %126, %133 : vector<8x128xf32>
    %135 = math.tanh %134 : vector<8x128xf32>
    %cst = arith.constant 9.750000e+02 : f32
    %136 = vector.broadcast %cst : f32 to vector<8x128xf32>
    %137 = arith.mulf %136, %135 : vector<8x128xf32>
    %cst_20 = arith.constant 1.025000e+03 : f32
    %138 = vector.broadcast %cst_20 : f32 to vector<8x128xf32>
    %139 = arith.addf %138, %137 : vector<8x128xf32>
    %c0_21 = arith.constant 0 : index
    %c0_22 = arith.constant 0 : index
    %140 = vector.load %arg5[%c0_21, %c0_22] : memref<8x128xf32, #tpu.memory_space<vmem>>, vector<8x128xf32>
    tpu.vector_store %arg5[%c0_21, %c0_22], %139 {strides = array<i32>} : memref<8x128xf32, #tpu.memory_space<vmem>>, vector<8x128xf32>,
    return
  }
  func.func @transform_0(%arg0: i32) -> (i32, i32) {
    %c0_i32 = arith.constant 0 : i32
    %c0_i32_0 = arith.constant 0 : i32
    return %arg0, %c0_i32 : i32, i32
  }
  func.func @transform_1(%arg0: i32) -> i32 {
    %c0_i32 = arith.constant 0 : i32
    %c0_i32_0 = arith.constant 0 : i32
    return %c0_i32 : i32
  }
  func.func @transform_2(%arg0: i32) -> i32 {
    %c0_i32 = arith.constant 0 : i32
    %c0_i32_0 = arith.constant 0 : i32
    return %c0_i32 : i32
  }
  func.func @transform_3(%arg0: i32) -> i32 {
    %c0_i32 = arith.constant 0 : i32
    %c0_i32_0 = arith.constant 0 : i32
    return %c0_i32 : i32
  }
  func.func @transform_4(%arg0: i32) -> (i32, i32) {
    %c0_i32 = arith.constant 0 : i32
    %c0_i32_0 = arith.constant 0 : i32
    return %arg0, %c0_i32 : i32, i32
  }
}

</mosaic_0001>

<bundles_post_ra>
// kernel: tpu_custom_call.1
= control target key start
LH: loop header
LB: loop body
LE: loop exit
PB: predicated region body
PF: predicated region fallthrough
CT: control target
= control target key end

     0   :  { %9 = vsyncpa [#allocation3], 0  ;;  %s460_s0 = inlined_call_operand.hbm [shape: f32[8,128], index: 0, kind: input, shape index: {}]   ;;  %s461_s1 = inlined_call_operand.hbm [shape: f32[16], index: 1, kind: input, shape index: {}]   ;;  %s462_s2 = inlined_call_operand.vmem [shape: f32[16], index: 2, kind: input, shape index: {}]   ;;  %s463_s3 = inlined_call_operand.vmem [shape: f32[2], index: 3, kind: input, shape index: {}]   ;;  %s464_s4 = inlined_call_operand.hbm [shape: f32[8,128], index: 4, kind: output, shape index: {}]  }
   0x1   :  { %10 = vsyncpa [#allocation5], 0 }
   0x2   :  { %11 = vsyncpa [#allocation6], 0 }
   0x3   :  { %12 = vsyncpa [#allocation10], 0 }
   0x4   :  { %13 = vsyncpa [#allocation4], 0  ;;  %s19_s17 = sshll.u32 %s460_s0, 4  ;;  %s360_s18 = smov [#allocation2]   ;;  %s20_s17 = int_to_ptr.hbm [resolvable:$true] %s19_s17 }
   0x5   :  { %s21_s19 = sshll.u32 %s360_s18, 4  ;;  %s30_s22 = sshll.u32 %s461_s1, 4  ;;  %s22_s19 = int_to_ptr.vmem [resolvable:$true] %s21_s19  ;;  %s31_s22 = int_to_ptr.hbm [resolvable:$true] %s30_s22 }
   0x6   :  { %24 = dma.hbm_to_vmem [thread:$0]  %s20_s17, 128, %s22_s19, [#allocation3]  }
   0x7   :  { %s361_s23 = smov [#allocation7]   ;;  %s39_s26 = sshll.u32 %s462_s2, 4  ;;  %s40_s26 = int_to_ptr.vmem [resolvable:$true] %s39_s26 }
   0x8   :  { %33 = dma.hbm_to_smem %s31_s22, 16, %s361_s23, [#allocation5]  }
   0x9   :  { %s48_s0 = sshll.u32 %s463_s3, 4  ;;  %s362_s29 = smov [#allocation8]   ;;  %s49_s0 = int_to_ptr.vmem [resolvable:$true] %s48_s0 }
   0xa   :  { %42 = dma.vmem_to_smem %s40_s26, 16, %s362_s29, [#allocation6]  }
   0xb   :  { %s363_s30 = smov [#allocation9]  }
   0xc   :  { %51 = dma.vmem_to_smem %s49_s0, 16, %s363_s30, [#allocation10]  }
   0xd   :  { %350 = dma.done.wait [#allocation3], 128  }
   0xe   :  { %351 = vsyncadd [#allocation3], 4294967168 }
   0xf   :  { %352 = dma.done.wait [#allocation5], 16  }
  0x10   :  { %353 = vsyncadd [#allocation5], 4294967280 }
  0x11   :  { %354 = dma.done.wait [#allocation6], 16  }
  0x12   :  { %355 = vsyncadd [#allocation6], 4294967280 }
  0x13   :  { %356 = dma.done.wait [#allocation10], 16  }
  0x14   :  { %357 = vsyncadd [#allocation10], 4294967280 }
  0x15   :  { %68 = sfence }
  0x16   :  { %s70_s1 = sld [smem:[#allocation9]]  ;;  %v402_v0 = vld [vmem:[#allocation2] sm:$0xff] }
  0x17   :  { %s228_s2 = sld [smem:[#allocation9 + $0x1]] }
  0x18   :  { %s76_s5 = sld [smem:[#allocation7]] }
  0x19   :  { %s80_s6 = sld [smem:[#allocation8]] }
  0x1a   :  { %s229_s7 = sld [smem:[#allocation7 + $0x1]] }
  0x1b   :  { %s230_s3 = sld [smem:[#allocation8 + $0x1]] }
  0x1c   :  { %v71_v1 = vstv %s70_s1  ;;  %s231_s8 = sld [smem:[#allocation7 + $0x2]] }
  0x1d   :  { %v72_v2 = vmul.f32 %v71_v1, %v402_v0  ;;  %s405_s9 = sld [smem:[#allocation8 + $0x2]]  ;;  %v74_v3 = vstv %s228_s2 }
  0x1e   :  { %v77_v4 = vstv %s76_s5  ;;  %s233_s10 = sld [smem:[#allocation7 + $0x3]] }
  0x1f   :  { %v78_v5 = vadd.f32 %v77_v4, %v402_v0  ;;  %s408_s11 = sld [smem:[#allocation8 + $0x3]]  ;;  %v81_v6 = vstv %s80_s6  ;;  %v75_v8 = vadd.f32 %v74_v3, %v72_v2 }
  0x20   :  { %v85_v7 = vstv %s229_s7  ;;  %s235_s12 = sld [smem:[#allocation7 + $0x4]]  ;;  %s364_s7 = smov [#allocation11]  }
  0x21   :  { %v79_v9 = vand.u32 2147483647, %v78_v5  ;;  %v86_v10 = vadd.f32 %v85_v7, %v402_v0  ;;  %s411_s13 = sld [smem:[#allocation8 + $0x4]]  ;;  %v89_v11 = vstv %s230_s3  ;;  %s213_s3 = sshll.u32 %s364_s7, 4  ;;  %s214_s3 = int_to_ptr.vmem [resolvable:$true] %s213_s3 }
  0x22   :  { %v93_v12 = vstv %s231_s8  ;;  %s237_s14 = sld [smem:[#allocation7 + $0x5]] }
  0x23   :  { %v82_v13 = vmul.f32 %v81_v6, %v79_v9  ;;  %v87_v14 = vand.u32 2147483647, %v86_v10  ;;  %v94_v15 = vadd.f32 %v93_v12, %v402_v0  ;;  %s414_s15 = sld [smem:[#allocation8 + $0x5]]  ;;  %v97_v16 = vstv %s405_s9 }
  0x24   :  { %v101_v17 = vstv %s233_s10  ;;  %s239_s16 = sld [smem:[#allocation7 + $0x6]]  ;;  %s215_s10 = sshll.u32 %s464_s4, 4  ;;  %s216_s10 = int_to_ptr.hbm [resolvable:$true] %s215_s10 }
  0x25   :  { %v83_v18 = vadd.f32 %v82_v13, %v75_v8  ;;  %v90_v19 = vmul.f32 %v89_v11, %v87_v14  ;;  %v95_v20 = vand.u32 2147483647, %v94_v15  ;;  %v102_v21 = vadd.f32 %v101_v17, %v402_v0  ;;  %s418_s17 = sld [smem:[#allocation8 + $0x6]] }
  0x26   :  { %v105_v22 = vstv %s408_s11  ;;  %v109_v23 = vstv %s235_s12  ;;  %s241_s18 = sld [smem:[#allocation7 + $0x7]] }
  0x27   :  { %v91_v24 = vadd.f32 %v90_v19, %v83_v18  ;;  %v98_v25 = vmul.f32 %v97_v16, %v95_v20  ;;  %v103_v26 = vand.u32 2147483647, %v102_v21  ;;  %v110_v27 = vadd.f32 %v109_v23, %v402_v0  ;;  %s422_s19 = sld [smem:[#allocation8 + $0x7]] }
  0x28   :  { %v113_v28 = vstv %s411_s13  ;;  %v117_v29 = vstv %s237_s14  ;;  %s243_s20 = sld [smem:[#allocation7 + $0x8]] }
  0x29   :  { %v99_v30 = vadd.f32 %v98_v25, %v91_v24  ;;  %v106_v31 = vmul.f32 %v105_v22, %v103_v26  ;;  %v111_v32 = vand.u32 2147483647, %v110_v27  ;;  %v118_v33 = vadd.f32 %v117_v29, %v402_v0  ;;  %s426_s21 = sld [smem:[#allocation8 + $0x8]] }
  0x2a   :  { %v121_v34 = vstv %s414_s15  ;;  %v125_v35 = vstv %s239_s16  ;;  %s245_s22 = sld [smem:[#allocation7 + $0x9]] }
  0x2b   :  { %v107_v36 = vadd.f32 %v106_v31, %v99_v30  ;;  %v114_v37 = vmul.f32 %v113_v28, %v111_v32  ;;  %v119_v38 = vand.u32 2147483647, %v118_v33  ;;  %v126_v39 = vadd.f32 %v125_v35, %v402_v0  ;;  %s430_s23 = sld [smem:[#allocation8 + $0x9]] }
  0x2c   :  { %v129_v40 = vstv %s418_s17  ;;  %v133_v41 = vstv %s241_s18  ;;  %s247_s24 = sld [smem:[#allocation7 + $0xa]] }
  0x2d   :  { %v115_v42 = vadd.f32 %v114_v37, %v107_v36  ;;  %v122_v43 = vmul.f32 %v121_v34, %v119_v38  ;;  %v127_v44 = vand.u32 2147483647, %v126_v39  ;;  %v134_v45 = vadd.f32 %v133_v41, %v402_v0  ;;  %s434_s25 = sld [smem:[#allocation8 + $0xa]] }
  0x2e   :  { %v137_v46 = vstv %s422_s19  ;;  %v141_v47 = vstv %s243_s20  ;;  %s249_s26 = sld [smem:[#allocation7 + $0xb]] }
  0x2f   :  { %v123_v48 = vadd.f32 %v122_v43, %v115_v42  ;;  %v130_v49 = vmul.f32 %v129_v40, %v127_v44  ;;  %v135_v50 = vand.u32 2147483647, %v134_v45  ;;  %v142_v51 = vadd.f32 %v141_v47, %v402_v0  ;;  %s438_s27 = sld [smem:[#allocation8 + $0xb]] }
  0x30   :  { %v145_v52 = vstv %s426_s21  ;;  %v149_v53 = vstv %s245_s22  ;;  %s251_s28 = sld [smem:[#allocation7 + $0xc]] }
  0x31   :  { %v131_v54 = vadd.f32 %v130_v49, %v123_v48  ;;  %v138_v55 = vmul.f32 %v137_v46, %v135_v50  ;;  %v143_v56 = vand.u32 2147483647, %v142_v51  ;;  %v150_v57 = vadd.f32 %v149_v53, %v402_v0  ;;  %s442_s0 = sld [smem:[#allocation8 + $0xc]] }
  0x32   :  { %v153_v58 = vstv %s430_s23  ;;  %v157_v59 = vstv %s247_s24  ;;  %s253_s29 = sld [smem:[#allocation7 + $0xd]] }
  0x33   :  { %v139_v60 = vadd.f32 %v138_v55, %v131_v54  ;;  %v146_v61 = vmul.f32 %v145_v52, %v143_v56  ;;  %v151_v62 = vand.u32 2147483647, %v150_v57  ;;  %v158_v63 = vadd.f32 %v157_v59, %v402_v0  ;;  %s446_s30 = sld [smem:[#allocation8 + $0xd]] }
  0x34   :  { %v161_v1 = vstv %s434_s25  ;;  %v165_v2 = vstv %s249_s26  ;;  %s255_s1 = sld [smem:[#allocation7 + $0xe]] }
  0x35   :  { %v147_v3 = vadd.f32 %v146_v61, %v139_v60  ;;  %v154_v4 = vmul.f32 %v153_v58, %v151_v62  ;;  %v159_v5 = vand.u32 2147483647, %v158_v63  ;;  %v166_v6 = vadd.f32 %v165_v2, %v402_v0  ;;  %s256_s2 = sld [smem:[#allocation8 + $0xe]] }
  0x36   :  { %v169_v7 = vstv %s438_s27  ;;  %v173_v8 = vstv %s251_s28  ;;  %s257_s5 = sld [smem:[#allocation7 + $0xf]] }
  0x37   :  { %v155_v9 = vadd.f32 %v154_v4, %v147_v3  ;;  %v162_v10 = vmul.f32 %v161_v1, %v159_v5  ;;  %v167_v11 = vand.u32 2147483647, %v166_v6  ;;  %v174_v12 = vadd.f32 %v173_v8, %v402_v0  ;;  %s258_s6 = sld [smem:[#allocation8 + $0xf]] }
  0x38   :  { %v177_v13 = vstv %s442_s0  ;;  %v181_v14 = vstv %s253_s29 }
  0x39   :  { %v163_v15 = vadd.f32 %v162_v10, %v155_v9  ;;  %v170_v16 = vmul.f32 %v169_v7, %v167_v11  ;;  %v175_v17 = vand.u32 2147483647, %v174_v12  ;;  %v182_v18 = vadd.f32 %v181_v14, %v402_v0 }
  0x3a   :  { %v185_v19 = vstv %s446_s30  ;;  %v189_v20 = vstv %s255_s1 }
  0x3b   :  { %v171_v21 = vadd.f32 %v170_v16, %v163_v15  ;;  %v178_v22 = vmul.f32 %v177_v13, %v175_v17  ;;  %v183_v23 = vand.u32 2147483647, %v182_v18  ;;  %v190_v24 = vadd.f32 %v189_v20, %v402_v0 }
  0x3c   :  { %v193_v25 = vstv %s256_s2  ;;  %v197_v26 = vstv %s257_s5 }
  0x3d   :  { %v179_v27 = vadd.f32 %v178_v22, %v171_v21  ;;  %v186_v28 = vmul.f32 %v185_v19, %v183_v23  ;;  %v191_v29 = vand.u32 2147483647, %v190_v24  ;;  %v198_v30 = vadd.f32 %v197_v26, %v402_v0 }
  0x3e   :  { %v201_v31 = vstv %s258_s6 }
  0x3f   :  { %v187_v32 = vadd.f32 %v186_v28, %v179_v27  ;;  %v194_v33 = vmul.f32 %v193_v25, %v191_v29  ;;  %v199_v34 = vand.u32 2147483647, %v198_v30 }
  0x41   :  { %v195_v35 = vadd.f32 %v194_v33, %v187_v32  ;;  %v202_v36 = vmul.f32 %v201_v31, %v199_v34 }
  0x43   :  { %v203_v37 = vadd.f32 %v202_v36, %v195_v35 }
  0x45   :  { %264 = vtanh.f32 %v203_v37 }
  0x4b   :  { %v265_v38 = vpop.eup %264 }
  0x4c   :  { %v205_v39 = vmul.f32 975.0, %v265_v38 }
  0x4e   :  { %v206_v40 = vadd.f32 1025.0, %v205_v39 }
  0x50   :  { %207 = vst [vmem:[#allocation11] sm:$0xff] %v206_v40 }
  0x51   :  { %218 = dma.vmem_to_hbm [thread:$0]  %s214_s3, 128, %s216_s10, [#allocation4]  }
  0x52   :  { %358 = dma.done.wait [#allocation4], 128  }
  0x53   :  { %359 = vsyncadd [#allocation4], 4294967168 }
  0x54   :  { %223 = vsyncpa [#allocation3], 1 }
  0x55   :  { %224 = vsyncpa [#allocation4], 1 }
  0x56   :  { %225 = vsyncpa [#allocation5], 1 }
  0x57   :  { %226 = vsyncpa [#allocation6], 1 }
  0x58   :  { %227 = vsyncpa [#allocation10], 1 }

</bundles_post_ra>
